<compile_context>
chip_gen: v5e
topology: v5e:2x2
jax: 0.10.0
libtpu: 0.0.40
codegen_flags: <defaults>
</compile_context>

<pallas_src>
import functools

import jax
import jax.numpy as jnp
from jax.experimental import pallas as pl
from jax.experimental.pallas import tpu as pltpu

_F32_BYTES = 4
_DEFAULT_VMEM_BUDGET = 48 * 1024 * 1024  # raises v5e/v6e scoped default, fits v7x's 64 MiB


def _encoder_layer_kernel(n_head, d_k, d_v, compute_dtype,
                          x_ref, mask_ref, wqkv_ref, wfc_ref,
                          g1_ref, bt1_ref,
                          w1_ref, fb1_ref, w2_ref, fb2_ref,
                          g2_ref, bt2_ref,
                          out_ref, attn_ref):
    bb, T, D = x_ref.shape
    n_qk = n_head * d_k
    n_v = n_head * d_v
    cd = compute_dtype

    x3 = x_ref[...]                                    # (bb, T, D) original input (residual)
    x2 = x3.reshape(bb * T, D)                         # flatten batch*time for big matmuls

    # ---- LayerNorm (pre-attention), PyTorch default eps=1e-5, single-pass variance ----
    mu = jnp.mean(x2, axis=-1, keepdims=True)
    var = jnp.mean(x2 * x2, axis=-1, keepdims=True) - mu * mu
    xn = (x2 - mu) * jax.lax.rsqrt(var + 1e-5)
    xn = xn * g1_ref[0] + bt1_ref[0]                   # (bb*T, D)

    # ---- Fused Q/K/V projection: ONE MXU matmul, f32 accumulation ----
    qkv = jnp.dot(xn.astype(cd), wqkv_ref[...].astype(cd),
                  preferred_element_type=jnp.float32)  # (bb*T, 2*n_qk + n_v)

    inv_temp = 1.0 / (d_k ** 0.5)                      # compile-time constant
    q2 = (qkv[:, :n_qk] * inv_temp).reshape(bb, T, n_qk)
    k2 = qkv[:, n_qk:2 * n_qk].reshape(bb, T, n_qk)
    v2 = qkv[:, 2 * n_qk:].reshape(bb, T, n_v)

    # Heads -> batch dim, done ONCE (major-axis stack; the batched einsums below then
    # keep the MXU busy without per-head softmax in between).
    def to_heads(t, d):
        parts = [t[:, :, h * d:(h + 1) * d] for h in range(n_head)]
        return jnp.stack(parts, axis=1).reshape(bb * n_head, T, d)

    q = to_heads(q2, d_k)                              # (bb*H, T, d_k), already scaled
    k = to_heads(k2, d_k)                              # (bb*H, T, d_k)
    v = to_heads(v2, d_v)                              # (bb*H, T, d_v)

    # ---- Scores for ALL heads in one batched einsum (kept f32 for accuracy) ----
    # TODO(synk): tile over a query block here for production T >= 128.
    s = jnp.einsum('ntd,nsd->nts', q, k,
                   preferred_element_type=jnp.float32)             # (bb*H, T, T)
    mask3 = jnp.broadcast_to((mask_ref[...] == 1.0)[None, :, :],
                             (bb * n_head, T, T))                   # hoisted, done once
    s = jnp.where(mask3, jnp.float32(-1e9), s)                      # masked_fill

    # ---- One softmax over all heads; exact reciprocal then multiply ----
    m = jnp.max(s, axis=-1, keepdims=True)
    e = jnp.exp(s - m)
    p = e * (1.0 / jnp.sum(e, axis=-1, keepdims=True))              # (bb*H, T, T)

    attn_ref[...] = p.reshape(bb, n_head, T, T)                     # single block store

    # ---- Context for ALL heads in one batched einsum ----
    ctx = jnp.einsum('nts,nsd->ntd', p.astype(cd), v.astype(cd),
                     preferred_element_type=jnp.float32)            # (bb*H, T, d_v)
    ctx = ctx.reshape(bb, n_head, T, d_v)

    # ---- Output projection, accumulated per head in registers (no ctx scratch,
    #      no masked 8-lane VMEM stores, no unaligned lane concat). ----
    def proj(h):
        ch = ctx[:, h].reshape(bb * T, d_v)
        wh = wfc_ref[h * d_v:(h + 1) * d_v, :]
        return jnp.dot(ch.astype(cd), wh.astype(cd),
                       preferred_element_type=jnp.float32)
    attn_out = proj(0)
    for h in range(1, n_head):
        attn_out = attn_out + proj(h)

    # dropout (identity) + residual with ORIGINAL input
    enc = attn_out + x2                                              # (bb*T, D)

    # ---- PositionWiseFeedForward (its own pre-LN, eps=1e-6) ----
    mu2 = jnp.mean(enc, axis=-1, keepdims=True)
    var2 = jnp.mean(enc * enc, axis=-1, keepdims=True) - mu2 * mu2
    yn = (enc - mu2) * jax.lax.rsqrt(var2 + 1e-6)
    yn = yn * g2_ref[0] + bt2_ref[0]

    h1 = jnp.dot(yn.astype(cd), w1_ref[...].astype(cd),
                 preferred_element_type=jnp.float32) + fb1_ref[0]
    h1 = jnp.maximum(h1, 0.0)                                        # ReLU
    h2 = jnp.dot(h1.astype(cd), w2_ref[...].astype(cd),
                 preferred_element_type=jnp.float32) + fb2_ref[0]

    # dropout (identity) + residual
    out_ref[...] = (h2 + enc).reshape(bb, T, D)


def _vmem_estimate(bb, T, D, n_head, d_k, d_v, d_inner):
    """Rough VMEM footprint (pipeline double-buffers + kernel intermediates)."""
    n_qk, n_v = n_head * d_k, n_head * d_v
    weights = (D * (2 * n_qk + n_v) + n_v * D + D * d_inner + d_inner * D
               + 4 * D + d_inner + T * T) * _F32_BYTES
    x_blk = bb * T * D * _F32_BYTES
    out_blk = bb * T * D * _F32_BYTES
    attn_blk = bb * n_head * T * T * _F32_BYTES
    intermediates = (3 * attn_blk
                     + 3 * bb * T * (2 * n_qk + n_v) * _F32_BYTES
                     + 2 * bb * T * d_inner * _F32_BYTES
                     + 4 * bb * T * D * _F32_BYTES)
    return 2 * (x_blk + out_blk + attn_blk + weights) + intermediates


def _pick_batch_block(B, T, D, n_head, d_k, d_v, d_inner, vmem_budget):
    """Largest divisor of B that (a) fits the VMEM budget, (b) leaves >= 2 grid steps
    when B >= 2 (both v7x TensorCores), preferring MXU-friendly 128-aligned bb*T."""
    divisors = [d for d in range(B, 0, -1) if B % d == 0]

    def fits(bb):
        return _vmem_estimate(bb, T, D, n_head, d_k, d_v, d_inner) <= vmem_budget

    for need_aligned in (True, False):
        for bb in divisors:
            if B >= 2 and B // bb < 2:
                continue
            if need_aligned and (bb * T) % 128 != 0:
                continue
            if fits(bb):
                return bb
    for bb in divisors:              # fall back: single grid step if that's all that fits
        if fits(bb):
            return bb
    return 1


def prepare_params(params):
    """Fuse the Q/K/V projection weights once, at param-build time (not per call)."""
    fused = dict(params)
    fused["wqkv"] = jnp.concatenate([params["wq"], params["wk"], params["wv"]], axis=1)
    return fused


def encoder_layer(x, mask, params, *, n_head, d_k, d_v,
                  batch_block=None, compute_dtype=jnp.float32,
                  vmem_budget_bytes=_DEFAULT_VMEM_BUDGET):
    """Forward pass of EncoderLayer. compute_dtype=jnp.bfloat16 enables bf16 MXU
    operands (f32 accumulation) on v6e/v7x; keep f32 for tight-tolerance validation."""
    B, T, D = x.shape
    d_inner = params["w1"].shape[1]
    n_qk = n_head * d_k
    n_v = n_head * d_v

    wqkv = params.get("wqkv")
    if wqkv is None:  # fallback if caller didn't call prepare_params
        wqkv = jnp.concatenate([params["wq"], params["wk"], params["wv"]], axis=1)

    bb = batch_block if batch_block is not None else _pick_batch_block(
        B, T, D, n_head, d_k, d_v, d_inner, vmem_budget_bytes)
    assert B % bb == 0, "batch must be divisible by the batch block"
    grid = (B // bb,)

    kernel = functools.partial(_encoder_layer_kernel, n_head, d_k, d_v, compute_dtype)

    def rep(shape):  # replicated (constant index_map) operand
        n = len(shape)
        return pl.BlockSpec(shape, lambda b, _n=n: (0,) * _n)

    in_specs = [
        pl.BlockSpec((bb, T, D), lambda b: (b, 0, 0)),   # x
        rep((T, T)),                                     # mask
        rep((D, 2 * n_qk + n_v)),                        # fused wqkv
        rep((n_v, D)),                                   # wfc
        rep((1, D)), rep((1, D)),                        # ln1 gamma / beta
        rep((D, d_inner)), rep((1, d_inner)),            # w1, b1
        rep((d_inner, D)), rep((1, D)),                  # w2, b2
        rep((1, D)), rep((1, D)),                        # ln2 gamma / beta
    ]
    out_specs = (
        pl.BlockSpec((bb, T, D), lambda b: (b, 0, 0)),
        pl.BlockSpec((bb, n_head, T, T), lambda b: (b, 0, 0, 0)),
    )
    out_shape = (
        jax.ShapeDtypeStruct((B, T, D), jnp.float32),             # enc_output
        jax.ShapeDtypeStruct((B, n_head, T, T), jnp.float32),     # attn_weights
    )

    return pl.pallas_call(
        kernel,
        out_shape=out_shape,
        grid_spec=pltpu.PrefetchScalarGridSpec(
            num_scalar_prefetch=0,
            grid=grid,
            in_specs=in_specs,
            out_specs=out_specs,
        ),
        compiler_params=pltpu.CompilerParams(
            dimension_semantics=("parallel",),
            vmem_limit_bytes=int(vmem_budget_bytes)),
    )(x, mask, wqkv, params["wfc"],
      params["ln1_g"], params["ln1_b"],
      params["w1"], params["b1"], params["w2"], params["b2"],
      params["ln2_g"], params["ln2_b"])


def _reference(x, mask, p, *, n_head, d_k, d_v):
    """Pure-JAX reference mirroring the PyTorch forward (eval mode)."""
    B, T, D = x.shape

    def ln(z, g, b, eps):
        mu = jnp.mean(z, -1, keepdims=True)
        var = jnp.mean((z - mu) ** 2, -1, keepdims=True)
        return (z - mu) / jnp.sqrt(var + eps) * g + b

    residual = x
    xn = ln(x, p["ln1_g"][0], p["ln1_b"][0], 1e-5)
    q = (xn @ p["wq"]).reshape(B, T, n_head, d_k).transpose(0, 2, 1, 3)
    k = (xn @ p["wk"]).reshape(B, T, n_head, d_k).transpose(0, 2, 1, 3)
    v = (xn @ p["wv"]).reshape(B, T, n_head, d_v).transpose(0, 2, 1, 3)
    scores = jnp.einsum("bhqd,bhkd->bhqk", q / (d_k ** 0.5), k)
    scores = jnp.where(mask[None, None] == 1.0, -1e9, scores)
    attn = jax.nn.softmax(scores, axis=-1)
    o = jnp.einsum("bhqk,bhkd->bhqd", attn, v).transpose(0, 2, 1, 3).reshape(B, T, -1)
    o = o @ p["wfc"] + residual
    res2 = o
    on = ln(o, p["ln2_g"][0], p["ln2_b"][0], 1e-6)
    ff = jax.nn.relu(on @ p["w1"] + p["b1"][0]) @ p["w2"] + p["b2"][0]
    return ff + res2, attn


if __name__ == "__main__":
    # Small shapes consistent with EncoderLayer(d_time, d_feature, d_model, d_inner, n_head, d_k, d_v)
    B, d_time, d_model, d_inner = 2, 8, 32, 64
    n_head, d_k, d_v = 4, 8, 8

    key = jax.random.PRNGKey(0)
    ks = jax.random.split(key, 12)
    f32 = jnp.float32
    params = {
        "wq": jax.random.normal(ks[0], (d_model, n_head * d_k), f32) * 0.1,
        "wk": jax.random.normal(ks[1], (d_model, n_head * d_k), f32) * 0.1,
        "wv": jax.random.normal(ks[2], (d_model, n_head * d_v), f32) * 0.1,
        "wfc": jax.random.normal(ks[3], (n_head * d_v, d_model), f32) * 0.1,
        "ln1_g": jnp.ones((1, d_model), f32),
        "ln1_b": jnp.zeros((1, d_model), f32),
        "w1": jax.random.normal(ks[4], (d_model, d_inner), f32) * 0.1,
        "b1": jax.random.normal(ks[5], (1, d_inner), f32) * 0.05,
        "w2": jax.random.normal(ks[6], (d_inner, d_model), f32) * 0.1,
        "b2": jax.random.normal(ks[7], (1, d_model), f32) * 0.05,
        "ln2_g": jnp.ones((1, d_model), f32),
        "ln2_b": jnp.zeros((1, d_model), f32),
    }
    fused_params = prepare_params(params)   # QKV weight fusion done once

    x = jax.random.normal(ks[8], (B, d_time, d_model), f32)
    # diagonal_attention_mask=True  -> mask_time = eye(d_time)
    mask = jnp.eye(d_time, dtype=f32)

    enc_out, attn_w = encoder_layer(x, mask, fused_params, n_head=n_head, d_k=d_k, d_v=d_v)
    jax.block_until_ready(enc_out)
    jax.block_until_ready(attn_w)

    ref_out, ref_attn = _reference(x, mask, params, n_head=n_head, d_k=d_k, d_v=d_v)
    assert jnp.allclose(enc_out, ref_out, atol=1e-4, rtol=1e-4)
    assert jnp.allclose(attn_w, ref_attn, atol=1e-5, rtol=1e-4)

    print("KERNEL_OK")
</pallas_src>

<mosaic_0001>
module attributes {stable_mosaic.version = 11 : i64} {
  func.func @_encoder_layer_kernel(%arg0: i32, %arg1: memref<1x8x32xf32, #tpu.memory_space<vmem>>, %arg2: memref<8x8xf32, #tpu.memory_space<vmem>>, %arg3: memref<32x96xf32, #tpu.memory_space<vmem>>, %arg4: memref<32x32xf32, #tpu.memory_space<vmem>>, %arg5: memref<1x32xf32, #tpu.memory_space<vmem>>, %arg6: memref<1x32xf32, #tpu.memory_space<vmem>>, %arg7: memref<32x64xf32, #tpu.memory_space<vmem>>, %arg8: memref<1x64xf32, #tpu.memory_space<vmem>>, %arg9: memref<64x32xf32, #tpu.memory_space<vmem>>, %arg10: memref<1x32xf32, #tpu.memory_space<vmem>>, %arg11: memref<1x32xf32, #tpu.memory_space<vmem>>, %arg12: memref<1x32xf32, #tpu.memory_space<vmem>>, %arg13: memref<1x8x32xf32, #tpu.memory_space<vmem>>, %arg14: memref<1x4x8x8xf32, #tpu.memory_space<vmem>>) attributes {dimension_semantics = [#tpu.dimension_semantics<parallel>], iteration_bounds = array<i64: 2>, scalar_prefetch = 0 : i64, scratch_operands = 0 : i64, tpu.core_type = #tpu.core_type<tc>, window_params = [{transform_indices = @transform_0, window_bounds = array<i64: 1, 8, 32>}, {pipeline_mode = #tpu.pipeline_mode<synchronous>, transform_indices = @transform_1, window_bounds = array<i64: 8, 8>}, {pipeline_mode = #tpu.pipeline_mode<synchronous>, transform_indices = @transform_2, window_bounds = array<i64: 32, 96>}, {pipeline_mode = #tpu.pipeline_mode<synchronous>, transform_indices = @transform_3, window_bounds = array<i64: 32, 32>}, {pipeline_mode = #tpu.pipeline_mode<synchronous>, transform_indices = @transform_4, window_bounds = array<i64: 1, 32>}, {pipeline_mode = #tpu.pipeline_mode<synchronous>, transform_indices = @transform_5, window_bounds = array<i64: 1, 32>}, {pipeline_mode = #tpu.pipeline_mode<synchronous>, transform_indices = @transform_6, window_bounds = array<i64: 32, 64>}, {pipeline_mode = #tpu.pipeline_mode<synchronous>, transform_indices = @transform_7, window_bounds = array<i64: 1, 64>}, {pipeline_mode = #tpu.pipeline_mode<synchronous>, transform_indices = @transform_8, window_bounds = array<i64: 64, 32>}, {pipeline_mode = #tpu.pipeline_mode<synchronous>, transform_indices = @transform_9, window_bounds = array<i64: 1, 32>}, {pipeline_mode = #tpu.pipeline_mode<synchronous>, transform_indices = @transform_10, window_bounds = array<i64: 1, 32>}, {pipeline_mode = #tpu.pipeline_mode<synchronous>, transform_indices = @transform_11, window_bounds = array<i64: 1, 32>}, {transform_indices = @transform_12, window_bounds = array<i64: 1, 8, 32>}, {transform_indices = @transform_13, window_bounds = array<i64: 1, 4, 8, 8>}]} {
    %c0 = arith.constant 0 : index
    %c0_0 = arith.constant 0 : index
    %c0_1 = arith.constant 0 : index
    %0 = vector.load %arg1[%c0, %c0_0, %c0_1] : memref<1x8x32xf32, #tpu.memory_space<vmem>>, vector<1x8x32xf32>
    %1 = vector.shape_cast %0 : vector<1x8x32xf32> to vector<8x32xf32>
    %cst = arith.constant dense<0.000000e+00> : vector<8xf32>
    %2 = vector.multi_reduction <add>, %1, %cst [1] : vector<8x32xf32> to vector<8xf32>
    %3 = vector.shape_cast %2 : vector<8xf32> to vector<8x1xf32>
    %cst_2 = arith.constant 3.200000e+01 : f32
    %4 = vector.broadcast %cst_2 : f32 to vector<8x1xf32>
    %5 = arith.divf %3, %4 : vector<8x1xf32>
    %6 = arith.mulf %1, %1 : vector<8x32xf32>
    %cst_3 = arith.constant dense<0.000000e+00> : vector<8xf32>
    %7 = vector.multi_reduction <add>, %6, %cst_3 [1] : vector<8x32xf32> to vector<8xf32>
    %8 = vector.shape_cast %7 : vector<8xf32> to vector<8x1xf32>
    %cst_4 = arith.constant 3.200000e+01 : f32
    %9 = vector.broadcast %cst_4 : f32 to vector<8x1xf32>
    %10 = arith.divf %8, %9 : vector<8x1xf32>
    %11 = arith.mulf %5, %5 : vector<8x1xf32>
    %12 = arith.subf %10, %11 : vector<8x1xf32>
    %13 = vector.broadcast %5 : vector<8x1xf32> to vector<8x32xf32>
    %14 = arith.subf %1, %13 : vector<8x32xf32>
    %cst_5 = arith.constant 9.99999974E-6 : f32
    %15 = vector.broadcast %cst_5 : f32 to vector<8x1xf32>
    %16 = arith.addf %12, %15 : vector<8x1xf32>
    %17 = math.rsqrt %16 : vector<8x1xf32>
    %18 = vector.broadcast %17 : vector<8x1xf32> to vector<8x32xf32>
    %19 = arith.mulf %14, %18 : vector<8x32xf32>
    %c0_6 = arith.constant 0 : index
    %c0_7 = arith.constant 0 : index
    %20 = vector.load %arg5[%c0_6, %c0_7] : memref<1x32xf32, #tpu.memory_space<vmem>>, vector<1x32xf32>
    %21 = vector.shape_cast %20 : vector<1x32xf32> to vector<32xf32>
    %22 = vector.shape_cast %21 : vector<32xf32> to vector<1x32xf32>
    %23 = vector.broadcast %22 : vector<1x32xf32> to vector<8x32xf32>
    %24 = arith.mulf %19, %23 : vector<8x32xf32>
    %c0_8 = arith.constant 0 : index
    %c0_9 = arith.constant 0 : index
    %25 = vector.load %arg6[%c0_8, %c0_9] : memref<1x32xf32, #tpu.memory_space<vmem>>, vector<1x32xf32>
    %26 = vector.shape_cast %25 : vector<1x32xf32> to vector<32xf32>
    %27 = vector.shape_cast %26 : vector<32xf32> to vector<1x32xf32>
    %28 = vector.broadcast %27 : vector<1x32xf32> to vector<8x32xf32>
    %29 = arith.addf %24, %28 : vector<8x32xf32>
    %c0_10 = arith.constant 0 : index
    %c0_11 = arith.constant 0 : index
    %30 = vector.load %arg3[%c0_10, %c0_11] : memref<32x96xf32, #tpu.memory_space<vmem>>, vector<32x96xf32>
    %cst_12 = arith.constant dense<0.000000e+00> : vector<8x96xf32>
    %31 = tpu.matmul %29, %30, %cst_12 {dimension_numbers = #tpu.dot_dimension_numbers<[1], [0], [0], [1], [0, 0, 1, 1], [], []>} : vector<8x32xf32>, vector<32x96xf32>, vector<8x96xf32> -> vector<8x96xf32>
    %32 = vector.extract_strided_slice %31 {offsets = [0, 0], sizes = [8, 32], strides = [1, 1]} : vector<8x96xf32> to vector<8x32xf32>
    %cst_13 = arith.constant 0.353553385 : f32
    %33 = vector.broadcast %cst_13 : f32 to vector<8x32xf32>
    %34 = arith.mulf %32, %33 : vector<8x32xf32>
    %35 = vector.shape_cast %34 : vector<8x32xf32> to vector<1x8x32xf32>
    %36 = vector.extract_strided_slice %31 {offsets = [0, 32], sizes = [8, 32], strides = [1, 1]} : vector<8x96xf32> to vector<8x32xf32>
    %37 = vector.shape_cast %36 : vector<8x32xf32> to vector<1x8x32xf32>
    %38 = vector.extract_strided_slice %31 {offsets = [0, 64], sizes = [8, 32], strides = [1, 1]} : vector<8x96xf32> to vector<8x32xf32>
    %39 = vector.shape_cast %38 : vector<8x32xf32> to vector<1x8x32xf32>
    %40 = vector.extract_strided_slice %35 {offsets = [0, 0, 0], sizes = [1, 8, 8], strides = [1, 1, 1]} : vector<1x8x32xf32> to vector<1x8x8xf32>
    %41 = vector.extract_strided_slice %35 {offsets = [0, 0, 8], sizes = [1, 8, 8], strides = [1, 1, 1]} : vector<1x8x32xf32> to vector<1x8x8xf32>
    %42 = vector.extract_strided_slice %35 {offsets = [0, 0, 16], sizes = [1, 8, 8], strides = [1, 1, 1]} : vector<1x8x32xf32> to vector<1x8x8xf32>
    %43 = vector.extract_strided_slice %35 {offsets = [0, 0, 24], sizes = [1, 8, 8], strides = [1, 1, 1]} : vector<1x8x32xf32> to vector<1x8x8xf32>
    %44 = vector.shape_cast %40 : vector<1x8x8xf32> to vector<1x1x8x8xf32>
    %45 = vector.shape_cast %41 : vector<1x8x8xf32> to vector<1x1x8x8xf32>
    %46 = vector.shape_cast %42 : vector<1x8x8xf32> to vector<1x1x8x8xf32>
    %47 = vector.shape_cast %43 : vector<1x8x8xf32> to vector<1x1x8x8xf32>
    %48 = tpu.concatenate %44, %45, %46, %47 in 1 : vector<1x1x8x8xf32>, vector<1x1x8x8xf32>, vector<1x1x8x8xf32>, vector<1x1x8x8xf32> -> vector<1x4x8x8xf32>
    %49 = vector.shape_cast %48 : vector<1x4x8x8xf32> to vector<4x8x8xf32>
    %50 = vector.extract_strided_slice %37 {offsets = [0, 0, 0], sizes = [1, 8, 8], strides = [1, 1, 1]} : vector<1x8x32xf32> to vector<1x8x8xf32>
    %51 = vector.extract_strided_slice %37 {offsets = [0, 0, 8], sizes = [1, 8, 8], strides = [1, 1, 1]} : vector<1x8x32xf32> to vector<1x8x8xf32>
    %52 = vector.extract_strided_slice %37 {offsets = [0, 0, 16], sizes = [1, 8, 8], strides = [1, 1, 1]} : vector<1x8x32xf32> to vector<1x8x8xf32>
    %53 = vector.extract_strided_slice %37 {offsets = [0, 0, 24], sizes = [1, 8, 8], strides = [1, 1, 1]} : vector<1x8x32xf32> to vector<1x8x8xf32>
    %54 = vector.shape_cast %50 : vector<1x8x8xf32> to vector<1x1x8x8xf32>
    %55 = vector.shape_cast %51 : vector<1x8x8xf32> to vector<1x1x8x8xf32>
    %56 = vector.shape_cast %52 : vector<1x8x8xf32> to vector<1x1x8x8xf32>
    %57 = vector.shape_cast %53 : vector<1x8x8xf32> to vector<1x1x8x8xf32>
    %58 = tpu.concatenate %54, %55, %56, %57 in 1 : vector<1x1x8x8xf32>, vector<1x1x8x8xf32>, vector<1x1x8x8xf32>, vector<1x1x8x8xf32> -> vector<1x4x8x8xf32>
    %59 = vector.shape_cast %58 : vector<1x4x8x8xf32> to vector<4x8x8xf32>
    %60 = vector.extract_strided_slice %39 {offsets = [0, 0, 0], sizes = [1, 8, 8], strides = [1, 1, 1]} : vector<1x8x32xf32> to vector<1x8x8xf32>
    %61 = vector.extract_strided_slice %39 {offsets = [0, 0, 8], sizes = [1, 8, 8], strides = [1, 1, 1]} : vector<1x8x32xf32> to vector<1x8x8xf32>
    %62 = vector.extract_strided_slice %39 {offsets = [0, 0, 16], sizes = [1, 8, 8], strides = [1, 1, 1]} : vector<1x8x32xf32> to vector<1x8x8xf32>
    %63 = vector.extract_strided_slice %39 {offsets = [0, 0, 24], sizes = [1, 8, 8], strides = [1, 1, 1]} : vector<1x8x32xf32> to vector<1x8x8xf32>
    %64 = vector.shape_cast %60 : vector<1x8x8xf32> to vector<1x1x8x8xf32>
    %65 = vector.shape_cast %61 : vector<1x8x8xf32> to vector<1x1x8x8xf32>
    %66 = vector.shape_cast %62 : vector<1x8x8xf32> to vector<1x1x8x8xf32>
    %67 = vector.shape_cast %63 : vector<1x8x8xf32> to vector<1x1x8x8xf32>
    %68 = tpu.concatenate %64, %65, %66, %67 in 1 : vector<1x1x8x8xf32>, vector<1x1x8x8xf32>, vector<1x1x8x8xf32>, vector<1x1x8x8xf32> -> vector<1x4x8x8xf32>
    %69 = vector.shape_cast %68 : vector<1x4x8x8xf32> to vector<4x8x8xf32>
    "tpu.trace_start"() <{level = 10 : i32, message = "ntd,nsd->nts"}> : () -> ()
    %cst_14 = arith.constant dense<0.000000e+00> : vector<4x8x8xf32>
    %70 = tpu.matmul %49, %59, %cst_14 {dimension_numbers = #tpu.dot_dimension_numbers<[2], [2], [1], [1], [0, 0, 0, 1, 1, 1], [0], [0]>} : vector<4x8x8xf32>, vector<4x8x8xf32>, vector<4x8x8xf32> -> vector<4x8x8xf32>
    "tpu.trace_stop"() : () -> ()
    %c0_15 = arith.constant 0 : index
    %c0_16 = arith.constant 0 : index
    %71 = vector.load %arg2[%c0_15, %c0_16] : memref<8x8xf32, #tpu.memory_space<vmem>>, vector<8x8xf32>
    %cst_17 = arith.constant 1.000000e+00 : f32
    %72 = vector.broadcast %cst_17 : f32 to vector<8x8xf32>
    %73 = arith.cmpf oeq, %71, %72 : vector<8x8xf32>
    %74 = vector.shape_cast %73 : vector<8x8xi1> to vector<1x8x8xi1>
    %75 = vector.shape_cast %74 : vector<1x8x8xi1> to vector<1x8x8xi1>
    %76 = vector.broadcast %75 : vector<1x8x8xi1> to vector<4x8x8xi1>
    %cst_18 = arith.constant -1.000000e+09 : f32
    %77 = vector.broadcast %cst_18 : f32 to vector<4x8x8xf32>
    %78 = arith.select %76, %77, %70 : vector<4x8x8xi1>, vector<4x8x8xf32>
    %cst_19 = arith.constant dense<0xFF800000> : vector<4x8xf32>
    %79 = vector.multi_reduction <maximumf>, %78, %cst_19 [2] : vector<4x8x8xf32> to vector<4x8xf32>
    %80 = vector.shape_cast %79 : vector<4x8xf32> to vector<4x8x1xf32>
    %81 = vector.broadcast %80 : vector<4x8x1xf32> to vector<4x8x8xf32>
    %82 = arith.subf %78, %81 : vector<4x8x8xf32>
    %83 = math.exp %82 : vector<4x8x8xf32>
    %cst_20 = arith.constant dense<0.000000e+00> : vector<4x8xf32>
    %84 = vector.multi_reduction <add>, %83, %cst_20 [2] : vector<4x8x8xf32> to vector<4x8xf32>
    %85 = vector.shape_cast %84 : vector<4x8xf32> to vector<4x8x1xf32>
    %cst_21 = arith.constant 1.000000e+00 : f32
    %86 = vector.broadcast %cst_21 : f32 to vector<4x8x1xf32>
    %87 = arith.divf %86, %85 : vector<4x8x1xf32>
    %88 = vector.broadcast %87 : vector<4x8x1xf32> to vector<4x8x8xf32>
    %89 = arith.mulf %83, %88 : vector<4x8x8xf32>
    %90 = vector.shape_cast %89 : vector<4x8x8xf32> to vector<1x4x8x8xf32>
    %c0_22 = arith.constant 0 : index
    %c0_23 = arith.constant 0 : index
    %c0_24 = arith.constant 0 : index
    %c0_25 = arith.constant 0 : index
    %91 = vector.load %arg14[%c0_22, %c0_23, %c0_24, %c0_25] : memref<1x4x8x8xf32, #tpu.memory_space<vmem>>, vector<1x4x8x8xf32>
    tpu.vector_store %arg14[%c0_22, %c0_23, %c0_24, %c0_25], %90 {strides = array<i32>} : memref<1x4x8x8xf32, #tpu.memory_space<vmem>>, vector<1x4x8x8xf32>,
    "tpu.trace_start"() <{level = 10 : i32, message = "nts,nsd->ntd"}> : () -> ()
    %cst_26 = arith.constant dense<0.000000e+00> : vector<4x8x8xf32>
    %92 = tpu.matmul %89, %69, %cst_26 {dimension_numbers = #tpu.dot_dimension_numbers<[2], [1], [1], [2], [0, 0, 0, 1, 1, 2], [0], [0]>} : vector<4x8x8xf32>, vector<4x8x8xf32>, vector<4x8x8xf32> -> vector<4x8x8xf32>
    "tpu.trace_stop"() : () -> ()
    %93 = vector.shape_cast %92 : vector<4x8x8xf32> to vector<1x4x8x8xf32>
    %94 = vector.extract_strided_slice %93 {offsets = [0, 0, 0, 0], sizes = [1, 1, 8, 8], strides = [1, 1, 1, 1]} : vector<1x4x8x8xf32> to vector<1x1x8x8xf32>
    %95 = vector.shape_cast %94 : vector<1x1x8x8xf32> to vector<1x8x8xf32>
    %96 = vector.shape_cast %95 : vector<1x8x8xf32> to vector<8x8xf32>
    %c0_27 = arith.constant 0 : index
    %c0_28 = arith.constant 0 : index
    %97 = vector.load %arg4[%c0_27, %c0_28] : memref<32x32xf32, #tpu.memory_space<vmem>>, vector<8x32xf32>
    %cst_29 = arith.constant dense<0.000000e+00> : vector<8x32xf32>
    %98 = tpu.matmul %96, %97, %cst_29 {dimension_numbers = #tpu.dot_dimension_numbers<[1], [0], [0], [1], [0, 0, 1, 1], [], []>} : vector<8x8xf32>, vector<8x32xf32>, vector<8x32xf32> -> vector<8x32xf32>
    %99 = vector.extract_strided_slice %93 {offsets = [0, 1, 0, 0], sizes = [1, 1, 8, 8], strides = [1, 1, 1, 1]} : vector<1x4x8x8xf32> to vector<1x1x8x8xf32>
    %100 = vector.shape_cast %99 : vector<1x1x8x8xf32> to vector<1x8x8xf32>
    %101 = vector.shape_cast %100 : vector<1x8x8xf32> to vector<8x8xf32>
    %c8 = arith.constant 8 : index
    %c0_30 = arith.constant 0 : index
    %102 = vector.load %arg4[%c8, %c0_30] : memref<32x32xf32, #tpu.memory_space<vmem>>, vector<8x32xf32>
    %cst_31 = arith.constant dense<0.000000e+00> : vector<8x32xf32>
    %103 = tpu.matmul %101, %102, %cst_31 {dimension_numbers = #tpu.dot_dimension_numbers<[1], [0], [0], [1], [0, 0, 1, 1], [], []>} : vector<8x8xf32>, vector<8x32xf32>, vector<8x32xf32> -> vector<8x32xf32>
    %104 = arith.addf %98, %103 : vector<8x32xf32>
    %105 = vector.extract_strided_slice %93 {offsets = [0, 2, 0, 0], sizes = [1, 1, 8, 8], strides = [1, 1, 1, 1]} : vector<1x4x8x8xf32> to vector<1x1x8x8xf32>
    %106 = vector.shape_cast %105 : vector<1x1x8x8xf32> to vector<1x8x8xf32>
    %107 = vector.shape_cast %106 : vector<1x8x8xf32> to vector<8x8xf32>
    %c16 = arith.constant 16 : index
    %c0_32 = arith.constant 0 : index
    %108 = vector.load %arg4[%c16, %c0_32] : memref<32x32xf32, #tpu.memory_space<vmem>>, vector<8x32xf32>
    %cst_33 = arith.constant dense<0.000000e+00> : vector<8x32xf32>
    %109 = tpu.matmul %107, %108, %cst_33 {dimension_numbers = #tpu.dot_dimension_numbers<[1], [0], [0], [1], [0, 0, 1, 1], [], []>} : vector<8x8xf32>, vector<8x32xf32>, vector<8x32xf32> -> vector<8x32xf32>
    %110 = arith.addf %104, %109 : vector<8x32xf32>
    %111 = vector.extract_strided_slice %93 {offsets = [0, 3, 0, 0], sizes = [1, 1, 8, 8], strides = [1, 1, 1, 1]} : vector<1x4x8x8xf32> to vector<1x1x8x8xf32>
    %112 = vector.shape_cast %111 : vector<1x1x8x8xf32> to vector<1x8x8xf32>
    %113 = vector.shape_cast %112 : vector<1x8x8xf32> to vector<8x8xf32>
    %c24 = arith.constant 24 : index
    %c0_34 = arith.constant 0 : index
    %114 = vector.load %arg4[%c24, %c0_34] : memref<32x32xf32, #tpu.memory_space<vmem>>, vector<8x32xf32>
    %cst_35 = arith.constant dense<0.000000e+00> : vector<8x32xf32>
    %115 = tpu.matmul %113, %114, %cst_35 {dimension_numbers = #tpu.dot_dimension_numbers<[1], [0], [0], [1], [0, 0, 1, 1], [], []>} : vector<8x8xf32>, vector<8x32xf32>, vector<8x32xf32> -> vector<8x32xf32>
    %116 = arith.addf %110, %115 : vector<8x32xf32>
    %117 = arith.addf %116, %1 : vector<8x32xf32>
    %cst_36 = arith.constant dense<0.000000e+00> : vector<8xf32>
    %118 = vector.multi_reduction <add>, %117, %cst_36 [1] : vector<8x32xf32> to vector<8xf32>
    %119 = vector.shape_cast %118 : vector<8xf32> to vector<8x1xf32>
    %cst_37 = arith.constant 3.200000e+01 : f32
    %120 = vector.broadcast %cst_37 : f32 to vector<8x1xf32>
    %121 = arith.divf %119, %120 : vector<8x1xf32>
    %122 = arith.mulf %117, %117 : vector<8x32xf32>
    %cst_38 = arith.constant dense<0.000000e+00> : vector<8xf32>
    %123 = vector.multi_reduction <add>, %122, %cst_38 [1] : vector<8x32xf32> to vector<8xf32>
    %124 = vector.shape_cast %123 : vector<8xf32> to vector<8x1xf32>
    %cst_39 = arith.constant 3.200000e+01 : f32
    %125 = vector.broadcast %cst_39 : f32 to vector<8x1xf32>
    %126 = arith.divf %124, %125 : vector<8x1xf32>
    %127 = arith.mulf %121, %121 : vector<8x1xf32>
    %128 = arith.subf %126, %127 : vector<8x1xf32>
    %129 = vector.broadcast %121 : vector<8x1xf32> to vector<8x32xf32>
    %130 = arith.subf %117, %129 : vector<8x32xf32>
    %cst_40 = arith.constant 9.99999997E-7 : f32
    %131 = vector.broadcast %cst_40 : f32 to vector<8x1xf32>
    %132 = arith.addf %128, %131 : vector<8x1xf32>
    %133 = math.rsqrt %132 : vector<8x1xf32>
    %134 = vector.broadcast %133 : vector<8x1xf32> to vector<8x32xf32>
    %135 = arith.mulf %130, %134 : vector<8x32xf32>
    %c0_41 = arith.constant 0 : index
    %c0_42 = arith.constant 0 : index
    %136 = vector.load %arg11[%c0_41, %c0_42] : memref<1x32xf32, #tpu.memory_space<vmem>>, vector<1x32xf32>
    %137 = vector.shape_cast %136 : vector<1x32xf32> to vector<32xf32>
    %138 = vector.shape_cast %137 : vector<32xf32> to vector<1x32xf32>
    %139 = vector.broadcast %138 : vector<1x32xf32> to vector<8x32xf32>
    %140 = arith.mulf %135, %139 : vector<8x32xf32>
    %c0_43 = arith.constant 0 : index
    %c0_44 = arith.constant 0 : index
    %141 = vector.load %arg12[%c0_43, %c0_44] : memref<1x32xf32, #tpu.memory_space<vmem>>, vector<1x32xf32>
    %142 = vector.shape_cast %141 : vector<1x32xf32> to vector<32xf32>
    %143 = vector.shape_cast %142 : vector<32xf32> to vector<1x32xf32>
    %144 = vector.broadcast %143 : vector<1x32xf32> to vector<8x32xf32>
    %145 = arith.addf %140, %144 : vector<8x32xf32>
    %c0_45 = arith.constant 0 : index
    %c0_46 = arith.constant 0 : index
    %146 = vector.load %arg7[%c0_45, %c0_46] : memref<32x64xf32, #tpu.memory_space<vmem>>, vector<32x64xf32>
    %cst_47 = arith.constant dense<0.000000e+00> : vector<8x64xf32>
    %147 = tpu.matmul %145, %146, %cst_47 {dimension_numbers = #tpu.dot_dimension_numbers<[1], [0], [0], [1], [0, 0, 1, 1], [], []>} : vector<8x32xf32>, vector<32x64xf32>, vector<8x64xf32> -> vector<8x64xf32>
    %c0_48 = arith.constant 0 : index
    %c0_49 = arith.constant 0 : index
    %148 = vector.load %arg8[%c0_48, %c0_49] : memref<1x64xf32, #tpu.memory_space<vmem>>, vector<1x64xf32>
    %149 = vector.shape_cast %148 : vector<1x64xf32> to vector<64xf32>
    %150 = vector.shape_cast %149 : vector<64xf32> to vector<1x64xf32>
    %151 = vector.broadcast %150 : vector<1x64xf32> to vector<8x64xf32>
    %152 = arith.addf %147, %151 : vector<8x64xf32>
    %cst_50 = arith.constant 0.000000e+00 : f32
    %153 = vector.broadcast %cst_50 : f32 to vector<8x64xf32>
    %154 = arith.maximumf %152, %153 : vector<8x64xf32>
    %c0_51 = arith.constant 0 : index
    %c0_52 = arith.constant 0 : index
    %155 = vector.load %arg9[%c0_51, %c0_52] : memref<64x32xf32, #tpu.memory_space<vmem>>, vector<64x32xf32>
    %cst_53 = arith.constant dense<0.000000e+00> : vector<8x32xf32>
    %156 = tpu.matmul %154, %155, %cst_53 {dimension_numbers = #tpu.dot_dimension_numbers<[1], [0], [0], [1], [0, 0, 1, 1], [], []>} : vector<8x64xf32>, vector<64x32xf32>, vector<8x32xf32> -> vector<8x32xf32>
    %c0_54 = arith.constant 0 : index
    %c0_55 = arith.constant 0 : index
    %157 = vector.load %arg10[%c0_54, %c0_55] : memref<1x32xf32, #tpu.memory_space<vmem>>, vector<1x32xf32>
    %158 = vector.shape_cast %157 : vector<1x32xf32> to vector<32xf32>
    %159 = vector.shape_cast %158 : vector<32xf32> to vector<1x32xf32>
    %160 = vector.broadcast %159 : vector<1x32xf32> to vector<8x32xf32>
    %161 = arith.addf %156, %160 : vector<8x32xf32>
    %162 = arith.addf %161, %117 : vector<8x32xf32>
    %163 = vector.shape_cast %162 : vector<8x32xf32> to vector<1x8x32xf32>
    %c0_56 = arith.constant 0 : index
    %c0_57 = arith.constant 0 : index
    %c0_58 = arith.constant 0 : index
    %164 = vector.load %arg13[%c0_56, %c0_57, %c0_58] : memref<1x8x32xf32, #tpu.memory_space<vmem>>, vector<1x8x32xf32>
    tpu.vector_store %arg13[%c0_56, %c0_57, %c0_58], %163 {strides = array<i32>} : memref<1x8x32xf32, #tpu.memory_space<vmem>>, vector<1x8x32xf32>,
    return
  }
  func.func @transform_0(%arg0: i32) -> (i32, i32, i32) {
    %c0_i32 = arith.constant 0 : i32
    %c0_i32_0 = arith.constant 0 : i32
    %c0_i32_1 = arith.constant 0 : i32
    return %arg0, %c0_i32, %c0_i32_0 : i32, i32, i32
  }
  func.func @transform_1(%arg0: i32) -> (i32, i32) {
    %c0_i32 = arith.constant 0 : i32
    %c0_i32_0 = arith.constant 0 : i32
    %c0_i32_1 = arith.constant 0 : i32
    return %c0_i32, %c0_i32_0 : i32, i32
  }
  func.func @transform_2(%arg0: i32) -> (i32, i32) {
    %c0_i32 = arith.constant 0 : i32
    %c0_i32_0 = arith.constant 0 : i32
    %c0_i32_1 = arith.constant 0 : i32
    return %c0_i32, %c0_i32_0 : i32, i32
  }
  func.func @transform_3(%arg0: i32) -> (i32, i32) {
    %c0_i32 = arith.constant 0 : i32
    %c0_i32_0 = arith.constant 0 : i32
    %c0_i32_1 = arith.constant 0 : i32
    return %c0_i32, %c0_i32_0 : i32, i32
  }
  func.func @transform_4(%arg0: i32) -> (i32, i32) {
    %c0_i32 = arith.constant 0 : i32
    %c0_i32_0 = arith.constant 0 : i32
    %c0_i32_1 = arith.constant 0 : i32
    return %c0_i32, %c0_i32_0 : i32, i32
  }
  func.func @transform_5(%arg0: i32) -> (i32, i32) {
    %c0_i32 = arith.constant 0 : i32
    %c0_i32_0 = arith.constant 0 : i32
    %c0_i32_1 = arith.constant 0 : i32
    return %c0_i32, %c0_i32_0 : i32, i32
  }
  func.func @transform_6(%arg0: i32) -> (i32, i32) {
    %c0_i32 = arith.constant 0 : i32
    %c0_i32_0 = arith.constant 0 : i32
    %c0_i32_1 = arith.constant 0 : i32
    return %c0_i32, %c0_i32_0 : i32, i32
  }
  func.func @transform_7(%arg0: i32) -> (i32, i32) {
    %c0_i32 = arith.constant 0 : i32
    %c0_i32_0 = arith.constant 0 : i32
    %c0_i32_1 = arith.constant 0 : i32
    return %c0_i32, %c0_i32_0 : i32, i32
  }
  func.func @transform_8(%arg0: i32) -> (i32, i32) {
    %c0_i32 = arith.constant 0 : i32
    %c0_i32_0 = arith.constant 0 : i32
    %c0_i32_1 = arith.constant 0 : i32
    return %c0_i32, %c0_i32_0 : i32, i32
  }
  func.func @transform_9(%arg0: i32) -> (i32, i32) {
    %c0_i32 = arith.constant 0 : i32
    %c0_i32_0 = arith.constant 0 : i32
    %c0_i32_1 = arith.constant 0 : i32
    return %c0_i32, %c0_i32_0 : i32, i32
  }
  func.func @transform_10(%arg0: i32) -> (i32, i32) {
    %c0_i32 = arith.constant 0 : i32
    %c0_i32_0 = arith.constant 0 : i32
    %c0_i32_1 = arith.constant 0 : i32
    return %c0_i32, %c0_i32_0 : i32, i32
  }
  func.func @transform_11(%arg0: i32) -> (i32, i32) {
    %c0_i32 = arith.constant 0 : i32
    %c0_i32_0 = arith.constant 0 : i32
    %c0_i32_1 = arith.constant 0 : i32
    return %c0_i32, %c0_i32_0 : i32, i32
  }
  func.func @transform_12(%arg0: i32) -> (i32, i32, i32) {
    %c0_i32 = arith.constant 0 : i32
    %c0_i32_0 = arith.constant 0 : i32
    %c0_i32_1 = arith.constant 0 : i32
    return %arg0, %c0_i32, %c0_i32_0 : i32, i32, i32
  }
  func.func @transform_13(%arg0: i32) -> (i32, i32, i32, i32) {
    %c0_i32 = arith.constant 0 : i32
    %c0_i32_0 = arith.constant 0 : i32
    %c0_i32_1 = arith.constant 0 : i32
    %c0_i32_2 = arith.constant 0 : i32
    return %arg0, %c0_i32, %c0_i32_0, %c0_i32_1 : i32, i32, i32, i32
  }
}

</mosaic_0001>

<bundles_post_ra>
// kernel: tpu_custom_call.1
= control target key start
LH: loop header
LB: loop body
LE: loop exit
PB: predicated region body
PF: predicated region fallthrough
CT: control target
= control target key end

     0   :  { %s1963_s0 = inlined_call_operand.hbm [shape: f32[2,8,32], index: 0, kind: input, shape index: {}]   ;;  %s1964_s1 = inlined_call_operand.hbm [shape: f32[8,8], index: 1, kind: input, shape index: {}]   ;;  %s1965_s2 = inlined_call_operand.vmem [shape: f32[32,96], index: 2, kind: input, shape index: {}]   ;;  %s1966_s3 = inlined_call_operand.vmem [shape: f32[32,32], index: 3, kind: input, shape index: {}]   ;;  %s1967_s4 = inlined_call_operand.vmem [shape: f32[1,32], index: 4, kind: input, shape index: {}]   ;;  %s1968_s5 = inlined_call_operand.vmem [shape: f32[1,32], index: 5, kind: input, shape index: {}]   ;;  %s1969_s6 = inlined_call_operand.vmem [shape: f32[32,64], index: 6, kind: input, shape index: {}]   ;;  %s1970_s7 = inlined_call_operand.vmem [shape: f32[1,64], index: 7, kind: input, shape index: {}]   ;;  %s1971_s8 = inlined_call_operand.vmem [shape: f32[64,32], index: 8, kind: input, shape index: {}]   ;;  %s1972_s9 = inlined_call_operand.vmem [shape: f32[1,32], index: 9, kind: input, shape index: {}]   ;;  %s1973_s10 = inlined_call_operand.vmem [shape: f32[1,32], index: 10, kind: input, shape index: {}]   ;;  %s1974_s11 = inlined_call_operand.vmem [shape: f32[1,32], index: 11, kind: input, shape index: {}]   ;;  %s1975_s12 = inlined_call_operand.hbm [shape: f32[2,8,32], index: 12, kind: output, shape index: {0}]   ;;  %s1976_s13 = inlined_call_operand.hbm [shape: f32[2,4,8,8], index: 13, kind: output, shape index: {1}]  }
   0x1   :  { %1984 = sst [smem:[#allocation19_spill]] %s1963_s0 }
   0x2   :  { %1985 = sst [smem:[#allocation20_spill]] %s1964_s1 }
   0x3   :  { %1986 = sst [smem:[#allocation21_spill]] %s1965_s2 }
   0x4   :  { %1987 = sst [smem:[#allocation22_spill]] %s1975_s12 }
   0x5   :  { %19 = vsyncpa [#allocation3], 0 }
   0x6   :  { %21 = vsyncpa [#allocation3 + $0x1], 0 }
   0x7   :  { %22 = vsyncpa [#allocation6], 0 }
   0x8   :  { %23 = vsyncpa [#allocation4], 0 }
   0x9   :  { %25 = vsyncpa [#allocation4 + $0x1], 0 }
   0xa   :  { %26 = vsyncpa [#allocation9], 0 }
   0xb   :  { %28 = vsyncpa [#allocation9 + $0x1], 0  ;;  %s1633_s25 = smov 0   ;;  %s1635_s26 = smov 0  }
   0xc   :  { %s1637_s27 = smov 0   ;;  %s1639_s28 = smov 0  }
   0xd LB: > { %1988 = sst [smem:[#allocation14_spill]] %s1540_s25  ;;  %s1654_s29 = sadd.s32 4294967295, %s1552_s28   ;;  %s1552_s28 = sphi %s1639_s28, %s2006_s28   ;;  %s1548_s27 = sphi %s1637_s27, %s2008_s27   ;;  %s1544_s26 = sphi %s1635_s26, %s2010_s26   ;;  %s1540_s25 = sphi %s1633_s25, %s2009_s25  }
   0xe   : > { %1989 = sst [smem:[#allocation15_spill]] %s1548_s27  ;;  %s1244_s30 = sadd.s32 4294967294, %s1552_s28  }
   0xf   : > { %p54_p0 = scmp.ne.s32.totalorder %s1544_s26, %s1540_s25  ;;  %p55_p1 = scmp.eq.s32.totalorder %s1654_s29, 0 }
  0x10   : > { %p309_p2 = scmp.eq.s32.totalorder %s1654_s29, 1  ;;  %p315_p3 = scmp.eq.s32.totalorder %s1244_s30, 1 }
  0x11   : > { %p1663_p4 = por %p55_p1, %p54_p0  ;;  %p1245_p5 = scmp.ge.s32.totalorder %s1552_s28, 1 }
  0x12   : > { %p1668_p6 = por %p315_p3, %p54_p0  ;;  %p348_p7 = scmp.lt.s32.totalorder %s1552_s28, 3 }
  0x13   : > { %s1993_s1 = sld [smem:[#allocation20_spill]]  ;;  %s1554_s20 = smov [#allocation5]  }
  0x14   : > { %s1991_s15 = scalar_select %p1668_p6, 1, 0 }
  0x15   : > { %p1676_p8 = pnand %p1245_p5, %p348_p7  ;;  %s362_s21 = sshll.u32 %s1554_s20, 4  ;;  %s363_s21 = int_to_ptr.vmem [resolvable:$true] %s362_s21 }
  0x16   : > { %1992 = sst [smem:[#allocation16_spill]] %s1991_s15  ;;  %s1686_s22 = sadd.s32 1, %s1552_s28  }
  0x17   : > { %p1292_p10 = pneg %p1676_p8  ;;  %1995 = sst [smem:[#allocation17_spill]] %s1686_s22 }
  0x18   : > { %s41_s23 = sadd.s32 1, %s1548_s27  ;;  %s38_s24 = ssub.s32 %s1552_s28, %s1686_s22 }
  0x19   : > { %s360_s18 = sshll.u32 %s1993_s1, 4  ;;  %p1293_p11 = pnand %p1292_p10, %p55_p1  ;;  %s361_s18 = int_to_ptr.hbm [resolvable:$true] %s360_s18 }
  0x1a   : > { %p39_p12 = scmp.eq.s32.totalorder %s38_s24, 0  ;;  %p48_p13 = scmp.ne.s32.totalorder %s1548_s27, %s1544_s26 }
  0x1b   : > { %1295 = dma.hbm_to_vmem [thread:$0]  (!%p1293_p11), %s361_s18, 128, %s363_s21, [#allocation6]  }
  0x1c   : > { %p49_p0 = scmp.eq.s32.totalorder %s1552_s28, 0  ;;  %p1699_p3 = por %p309_p2, %p48_p13 }
  0x1d   : > { %s1695_s30 = scalar_select %p39_p12, %s1548_s27, %s41_s23  }
  0x1e   : > { %p1308_p5 = scmp.lt.s32.totalorder %s1552_s28, 2  ;;  %s403_s17 = sand.u32 1, %s1548_s27  }
  0x1f   : > { %1996 = sst [smem:[#allocation18_spill]] %s1695_s30  ;;  %s1249_s20 = sshll.u32 %s1552_s28, 3 }
  0x20   : > { %p50_p7 = por %p49_p0, %p48_p13  ;;  %s1248_s1 = sshll.u32 %s403_s17, 3 }
  0x21   : > { %s1998_s0 = sld [smem:[#allocation19_spill]]  ;;  %s407_s21 = scalar_lea.vmem [#allocation2], %s1248_s1 }
  0x22   : > { %s415_s24 = sshll.u32 %s407_s21, 4  ;;  %p1709_p10 = pnand %p1308_p5, %p50_p7  ;;  %s416_s24 = int_to_ptr.vmem [resolvable:$true] %s415_s24 }
  0x23   : > { %s404_s30 = scalar_lea.sflag [#allocation3], %s403_s17 }
  0x24   : > { %p1424_p11 = pneg %p1709_p10 }
  0x27   : > { %s411_s22 = scalar_lea.hbm %s1998_s0, %s1249_s20  ;;  %s1427_s1 = scalar_lea.hbm %s1998_s0, 16 }
  0x28   : > { %s413_s18 = sshll.u32 %s411_s22, 4  ;;  %s414_s18 = int_to_ptr.hbm [resolvable:$true] %s413_s18 }
  0x29   : > { %s1420_s12 = sshra.s32 %s414_s18, 4  ;;  %s1421_s12 = int_to_ptr.hbm [resolvable:$true] %s1420_s12 }
  0x2a   : > { %s1422_s27 = scalar_lea.hbm %s1421_s12, 8  ;;  %p1428_p0 = scmp.lt.s32.totalorder %s1421_s12, %s1998_s0 }
  0x2b   : > { %p1423_p2 = scmp.ne.s32.totalorder %s1421_s12, %s1422_s27  ;;  %p1429_p5 = scmp.lt.s32.totalorder %s1427_s1, %s1422_s27 }
  0x2d   : > { %p1425_p12 = pnand %p1424_p11, %p1423_p2  ;;  %p1430_p7 = por %p1429_p5, %p1428_p0 }
  0x2f   : > { %p1426_p13 = pneg %p1425_p12 }
  0x31   : > { %p1431_p9 = pnand %p1430_p7, %p1426_p13 }
  0x33   : > { %1434 = shalt.err (!%p1431_p9)
}
  0x34   : > { %1299 = dma.hbm_to_vmem [thread:$0]  (!%p1709_p10), %s414_s18, 128, %s416_s24, %s404_s30  }
  0x35   : > { %424 = sbr.rel (%p1676_p8) target bundleno = 1652 (0x674), region = 68  ;;  %s1726_s17 = sand.u32 (!%p1676_p8), 1, %s1544_s26  }
  0x36   : > { %s1983_s21 = sshll.u32 (!%p1676_p8), %s1726_s17, 3  ;;  %s427_s25 = scalar_lea.sflag (!%p1676_p8), [#allocation3], %s1726_s17 }
  0x37   : > { %s430_s12 = scalar_lea.vmem (!%p1676_p8), [#allocation2], %s1983_s21 }
  0x3a   : > { %1523 = dma.done.wait (%p1663_p4), %s427_s25, 128  }
  0x3b   : > { %1525 = vsyncadd (%p1663_p4), %s427_s25, 4294967168 }
  0x3c   : > { %1527 = dma.done.wait (%p55_p1), [#allocation6], 128  }
  0x3d   : > { %1529 = vsyncadd (%p55_p1), [#allocation6], 4294967168  ;;  %vm485_vm0 = vcmask 261120   ;;  %v1740_v0 = vld [vmem:[%s430_s12] sm:$0xff]  ;;  %v1555_v4 = vmov 32.0   ;;  %s2000_s2 = sld [smem:[#allocation21_spill]] }
  0x3e   : > { %v486_v1 = vsel %vm485_vm0, %v1740_v0, 0.0  ;;  %v497_v2 = vmul.f32 %v1740_v0, %v1740_v0  ;;  %1368 = vrcp.f32 %v1555_v4  ;;  %v1362_v29 = vld [vmem:[%s1967_s4] ss:$0 sm:$0xff]  ;;  %s1556_s12 = smov 104   ;;  %s1557_s27 = smov 120   ;;  %vm571_vm5 = vcmask 64512  }
  0x3f   : > { %487 = vadd.xlane.f32.xlu0 %v486_v1  ;;  %v1363_v32 = vld [vmem:[%s1968_s5] ss:$0 sm:$0xff]  ;;  %s1558_s14 = smov 112   ;;  %s1559_s19 = smov 96   ;;  %v674_v47 = vld [vmem:[#allocation5] sm:$0xff] }
  0x40   : > { %v498_v3 = vsel %vm485_vm0, %v497_v2, 0.0  ;;  %vm675_vm6 = vcmp.eq.f32.partialorder %v674_v47, 1.0  ;;  %s1560_s30 = smov 64   ;;  %s1254_s18 = sshll.u32 %s1726_s17, 5 }
  0x41   : > { %s1817_s24 = scalar_lea.vmem [#allocation8], %s1254_s18  ;;  %s1281_s1 = sshll.u32 %s1654_s29, 5 }
  0x42   : > { %s1124_s25 = scalar_lea.hbm %s1976_s13, %s1281_s1  ;;  %s1470_s15 = scalar_lea.hbm %s1976_s13, 64 }
  0x43   : > { %v530_v10 = vld [vmem:[%s2000_s2 + $0x18] sm:$0xff]  ;;  %v529_v11 = vld [vmem:[%s2000_s2 + $0x10] sm:$0xff]  ;;  %v528_v13 = vld [vmem:[%s2000_s2 + $0x8] sm:$0xff] }
  0x44   : > { %v1369_v5 = vpop.eup %1368  ;;  %546 = vmatpush.msra.mxu0 %v530_v10  ;;  %v527_v15 = vld [vmem:[%s2000_s2] sm:$0xff] }
  0x45   : > { %v490_v6 = vmul.f32 32.0, %v1369_v5  ;;  %vm494_vm1 = vweird.f32 %v1369_v5 }
  0x46   : > { %547 = vmatpush.msra.mxu0 %v529_v11 }
  0x47   : > { %499 = vadd.xlane.f32.xlu0 %v498_v3  ;;  %v491_v7 = vsub.f32 1.0, %v490_v6 }
  0x48   : > { %548 = vmatpush.msra.mxu0 %v528_v13 }
  0x49   : > { %v492_v8 = vmul.f32 %v1369_v5, %v491_v7 }
  0x4a   : > { %549 = vmatpush.msra.mxu0 %v527_v15 }
  0x4b   : > { %v493_v9 = vadd.f32 %v1369_v5, %v492_v8 }
  0x4d   : > { %v1756_v14 = vsel %vm494_vm1, %v1369_v5, %v493_v9 }
  0xb2   : > { %v488_v12 = vpop.xlane.xlu0 %487 }
  0xb3   : > { %v496_v16 = vmul.f32 %v1756_v14, %v488_v12 }
  0xb5   : > { %v502_v18 = vmul.f32 %v496_v16, %v496_v16  ;;  %v504_v28 = vsub.f32 %v1740_v0, %v496_v16 }
  0xba   : > { %v500_v17 = vpop.xlane.xlu0 %499 }
  0xbb   : > { %v501_v19 = vmul.f32 %v500_v17, %v1756_v14 }
  0xbd   : > { %v503_v20 = vsub.f32 %v501_v19, %v502_v18 }
  0xbf   : > { %v505_v21 = vadd.f32 1e-05, %v503_v20 }
  0xc1   : > { %1370 = vrsqrt.f32 %v505_v21  ;;  %vm512_vm3 = vweird.f32 %v505_v21 }
  0xc7   : > { %v1371_v22 = vpop.eup %1370 }
  0xc8   : > { %v507_v23 = vmul.f32 %v1371_v22, %v505_v21  ;;  %vm513_vm2 = vweird.f32 %v1371_v22 }
  0xc9   : > { %vm514_vm4 = vmor %vm512_vm3, %vm513_vm2 }
  0xca   : > { %v508_v24 = vmul.f32 %v1371_v22, %v507_v23 }
  0xcc   : > { %v509_v25 = vmul.f32 0.5, %v508_v24 }
  0xce   : > { %v510_v26 = vsub.f32 1.5, %v509_v25 }
  0xd0   : > { %v511_v27 = vmul.f32 %v1371_v22, %v510_v26 }
  0xd2   : > { %v515_v30 = vsel %vm514_vm4, %v1371_v22, %v511_v27 }
  0xd3   : > { %v516_v31 = vmul.f32 %v515_v30, %v504_v28 }
  0xd5   : > { %v521_v33 = vmul.f32 %v1362_v29, %v516_v31 }
  0xd7   : > { %v526_v34 = vadd.f32 %v1363_v32, %v521_v33 }
  0xd9   : > { %1255 = vmatmul.msk.f32.vlgmr.msra.gmra.mxu0 %vm485_vm0, %v526_v34 }
 0x156   : > { %v1771_v35 = vpop.f32.mrf.mxu0 }
 0x157   : > { %567 = vrot.lane.b32.xlu2 %v1771_v35, %s1556_s12  ;;  %563 = vrot.lane.b32.xlu1 %v1771_v35, %s1557_s27  ;;  %v554_v36 = vmul.f32 0.35355338, %v1771_v35 }
 0x159   : > { %556 = vrot.lane.b32.xlu0 %v554_v36, %s1557_s27  ;;  %s1127_s27 = sshll.u32 %s1124_s25, 4  ;;  %s1128_s27 = int_to_ptr.hbm [resolvable:$true] %s1127_s27 }
 0x15f   : > { %565 = vrot.lane.b32.xlu1 %v1771_v35, %s1558_s14 }
 0x167   : > { %569 = vrot.lane.b32.xlu1 %v1771_v35, %s1559_s19 }
 0x1b1   : > { %v1778_v37 = vpop.permute.xlu2 %567 }
 0x1b2   : > { %648 = vrot.lane.b32.xlu1 %v1778_v37, %s1559_s19 }
 0x1ba   : > { %560 = vrot.lane.b32.xlu1 %v554_v36, %s1556_s12  ;;  %s1125_s12 = sshll.u32 %s1817_s24, 4  ;;  %s1126_s12 = int_to_ptr.vmem [resolvable:$true] %s1125_s12 }
 0x1c9   : > { %v1781_v38 = vpop.permute.xlu1 %563 }
 0x1ca   : > { %596 = vrot.lane.b32.xlu2 %v1781_v38, %s1559_s19  ;;  %v1352_v18 = vpack.i.bf16 %v1781_v38, %v1771_v35 }
 0x1cb   : > { %v557_v43 = vpop.permute.xlu0 %556 }
 0x1d1   : > { %v1784_v39 = vpop.permute.xlu1 %565 }
 0x1d2   : > { %622 = vrot.lane.b32.xlu2 %v1784_v39, %s1559_s19  ;;  %v1357_v19 = vpack.i.bf16 %v1778_v37, %v1784_v39  ;;  %s1464_s19 = sshra.s32 %s1128_s27, 4  ;;  %s1465_s19 = int_to_ptr.hbm [resolvable:$true] %s1464_s19 }
 0x1d3   : > { %p1471_p9 = scmp.lt.s32.totalorder %s1465_s19, %s1976_s13 }
 0x1d9   : > { %v570_v40 = vpop.permute.xlu1 %569 }
 0x1da   : > { %1256 = vmatpush.xpose.msk.msra.mxu1 %vm571_vm5, %v570_v40  ;;  %558 = vrot.lane.b32.xlu2 %v554_v36, %s1558_s14  ;;  %s1099_s14 = scalar_lea.sflag [#allocation9], %s1726_s17 }
 0x1dd   : > { %1257 = vmatmul.msk.f32.vlgmr.msra.gmra.mxu1 %vm571_vm5, %v554_v36 }
 0x224   : > { %v597_v41 = vpop.permute.xlu2 %596  ;;  %v649_v42 = vpop.permute.xlu1 %648 }
 0x225   : > { %1258 = vmatpush.xpose.msk.msra.mxu2 %vm571_vm5, %v597_v41  ;;  %1262 = vmatpush.xpose.msk.msrb.mxu1 %vm571_vm5, %v649_v42 }
 0x228   : > { %1259 = vmatmul.msk.f32.vlgmr.msra.gmra.mxu2 %vm571_vm5, %v557_v43 }
 0x22c   : > { %v623_v44 = vpop.permute.xlu2 %622  ;;  %v561_v45 = vpop.permute.xlu1 %560 }
 0x22d   : > { %1260 = vmatpush.xpose.msk.msrb.mxu0 %vm571_vm5, %v623_v44  ;;  %1263 = vmatmul.msk.f32.vlgmr.msrb.gmra.mxu1 %vm571_vm5, %v561_v45 }
 0x234   : > { %v559_v46 = vpop.permute.xlu2 %558 }
 0x235   : > { %1261 = vmatmul.msk.f32.vlgmr.msrb.gmra.mxu0 %vm571_vm5, %v559_v46 }
 0x25a   : > { %v593_v48 = vpop.f32.mrf.mxu1 }
 0x25b   : > { %v678_v49 = vsel %vm675_vm6, -1e+09, %v593_v48 }
 0x25c   : > { %v682_v50 = vsel %vm571_vm5, %v678_v49, -inf }
 0x25d   : > { %683 = vmax.xlane.f32.xlu2 %v682_v50 }
 0x2aa   : > { %v671_v51 = vpop.f32.mrf.mxu1 }
 0x2ab   : > { %v681_v52 = vsel %vm675_vm6, -1e+09, %v671_v51  ;;  %v619_v53 = vpop.f32.mrf.mxu2 }
 0x2ac   : > { %v679_v54 = vsel %vm675_vm6, -1e+09, %v619_v53  ;;  %v691_v55 = vsel %vm571_vm5, %v681_v52, -inf }
 0x2ad   : > { %692 = vmax.xlane.f32.xlu2 %v691_v55  ;;  %v685_v56 = vsel %vm571_vm5, %v679_v54, -inf }
 0x2ae   : > { %686 = vmax.xlane.f32.xlu0 %v685_v56 }
 0x2b2   : > { %v645_v57 = vpop.f32.mrf.mxu0 }
 0x2b3   : > { %v680_v58 = vsel %vm675_vm6, -1e+09, %v645_v57 }
 0x2b4   : > { %v688_v59 = vsel %vm571_vm5, %v680_v58, -inf }
 0x2b5   : > { %689 = vmax.xlane.f32.xlu1 %v688_v59 }
 0x2d0   : > { %v684_v60 = vpop.xlane.xlu2 %683 }
 0x2d1   : > { %v694_v61 = vsub.f32 %v678_v49, %v684_v60 }
 0x2d3   : > { %v698_v62 = vmul.f32 1.442695, %v694_v61 }
 0x2d5   : > { %1372 = vpow2.f32 %v698_v62 }
 0x2db   : > { %v1373_v63 = vpop.eup %1372 }
 0x2dc   : > { %v706_v1 = vsel %vm571_vm5, %v1373_v63, 0.0 }
 0x2dd   : > { %707 = vadd.xlane.f32.xlu0 %v706_v1 }
 0x320   : > { %v693_v2 = vpop.xlane.xlu2 %692 }
 0x321   : > { %v697_v3 = vsub.f32 %v681_v52, %v693_v2  ;;  %v687_v4 = vpop.xlane.xlu0 %686 }
 0x322   : > { %v695_v5 = vsub.f32 %v679_v54, %v687_v4 }
 0x323   : > { %v704_v6 = vmul.f32 1.442695, %v697_v3 }
 0x324   : > { %v700_v7 = vmul.f32 1.442695, %v695_v5 }
 0x325   : > { %1374 = vpow2.f32 %v704_v6 }
 0x326   : > { %1376 = vpow2.f32 %v700_v7 }
 0x328   : > { %v690_v8 = vpop.xlane.xlu1 %689 }
 0x329   : > { %v696_v9 = vsub.f32 %v680_v58, %v690_v8 }
 0x32b   : > { %v1800_v10 = vpop.eup %1374  ;;  %v702_v11 = vmul.f32 1.442695, %v696_v9 }
 0x32c   : > { %v1802_v12 = vpop.eup %1376  ;;  %v715_v13 = vsel %vm571_vm5, %v1800_v10, 0.0 }
 0x32d   : > { %1378 = vpow2.f32 %v702_v11  ;;  %716 = vadd.xlane.f32.xlu0 %v715_v13  ;;  %v709_v15 = vsel %vm571_vm5, %v1802_v12, 0.0  ;;  %v890_v11 = vld [vmem:[%s1966_s3] sm:$0xff]  ;;  %v938_v13 = vld [vmem:[%s1966_s3 + $0x10] sm:$0xff] }
 0x32e   : > { %710 = vadd.xlane.f32.xlu2 %v709_v15  ;;  %v963_v15 = vld [vmem:[%s1966_s3 + $0x18] sm:$0xff] }
 0x333   : > { %v1808_v16 = vpop.eup %1378 }
 0x334   : > { %v712_v17 = vsel %vm571_vm5, %v1808_v16, 0.0 }
 0x335   : > { %713 = vadd.xlane.f32.xlu1 %v712_v17 }
 0x346   : > { %1353 = vrot.lane.b32.xlu2 %v1352_v18, %s1560_s30 }
 0x34e   : > { %1358 = vrot.lane.b32.xlu1 %v1357_v19, %s1560_s30  ;;  %s1466_s30 = scalar_lea.hbm %s1465_s19, 32 }
 0x34f   : > { %p1467_p1 = scmp.ne.s32.totalorder %s1465_s19, %s1466_s30  ;;  %p1472_p10 = scmp.lt.s32.totalorder %s1470_s15, %s1466_s30 }
 0x350   : > { %v708_v20 = vpop.xlane.xlu0 %707 }
 0x351   : > { %1380 = vrcp.f32 %v708_v20  ;;  %v729_v24 = vand.u32 2147483648, %v708_v20  ;;  %v727_v26 = vand.u32 2147483647, %v708_v20  ;;  %vm723_vm8 = vweird.f32 %v708_v20  ;;  %p1468_p4 = pnand %p1467_p1, %p1699_p3  ;;  %p1473_p2 = por %p1472_p10, %p1471_p9 }
 0x353   : > { %v730_v28 = vor.u32 1.1754944e-38, %v729_v24  ;;  %vm728_vm10 = vcmp.eq.f32.partialorder %v727_v26, 8.507059e+37  ;;  %p1469_p8 = pneg %p1468_p4 }
 0x355   : > { %p1474_p11 = pnand %p1473_p2, %p1469_p8 }
 0x357   : > { %v1381_v21 = vpop.eup %1380 }
 0x358   : > { %v719_v22 = vmul.f32 %v1381_v21, %v708_v20  ;;  %vm724_vm7 = vweird.f32 %v1381_v21 }
 0x359   : > { %vm725_vm9 = vmor %vm723_vm8, %vm724_vm7 }
 0x35a   : > { %v720_v23 = vsub.f32 1.0, %v719_v22 }
 0x35c   : > { %v721_v25 = vmul.f32 %v1381_v21, %v720_v23 }
 0x35e   : > { %v722_v27 = vadd.f32 %v1381_v21, %v721_v25 }
 0x360   : > { %v726_v29 = vsel %vm725_vm9, %v1381_v21, %v722_v27 }
 0x361   : > { %v731_v30 = vsel %vm728_vm10, %v730_v28, %v726_v29 }
 0x362   : > { %v778_v31 = vmul.f32 %v1373_v63, %v731_v30 }
 0x364   : > { %782 = vst.msk [vmem:[%s1817_s24] sm:$0xff] %vm571_vm5, %v778_v31 }
 0x3a0   : > { %v717_v32 = vpop.xlane.xlu0 %716 }
 0x3a1   : > { %1382 = vrcp.f32 %v717_v32  ;;  %v711_v33 = vpop.xlane.xlu2 %710  ;;  %v774_v43 = vand.u32 2147483648, %v717_v32  ;;  %v772_v46 = vand.u32 2147483647, %v717_v32  ;;  %vm768_vm13 = vweird.f32 %v717_v32 }
 0x3a2   : > { %1384 = vrcp.f32 %v711_v33  ;;  %v744_v47 = vand.u32 2147483648, %v711_v33  ;;  %v742_v49 = vand.u32 2147483647, %v711_v33  ;;  %vm738_vm15 = vweird.f32 %v711_v33 }
 0x3a3   : > { %v775_v52 = vor.u32 1.1754944e-38, %v774_v43  ;;  %vm773_vm1 = vcmp.eq.f32.partialorder %v772_v46, 8.507059e+37  ;;  %v1059_v43 = vld [vmem:[%s1971_s8 + $0x20] sm:$0xff] }
 0x3a4   : > { %v745_v55 = vor.u32 1.1754944e-38, %v744_v47  ;;  %vm743_vm3 = vcmp.eq.f32.partialorder %v742_v49, 8.507059e+37 }
 0x3a7   : > { %v1383_v34 = vpop.eup %1382 }
 0x3a8   : > { %v1385_v35 = vpop.eup %1384  ;;  %v764_v36 = vmul.f32 %v1383_v34, %v717_v32  ;;  %v714_v37 = vpop.xlane.xlu1 %713  ;;  %vm769_vm11 = vweird.f32 %v1383_v34  ;;  %v1026_v32 = vld [vmem:[%s1969_s6 + $0x18] sm:$0xff] }
 0x3a9   : > { %v734_v38 = vmul.f32 %v1385_v35, %v711_v33  ;;  %1386 = vrcp.f32 %v714_v37  ;;  %v1354_v39 = vpop.permute.xlu2 %1353  ;;  %vm739_vm12 = vweird.f32 %v1385_v35  ;;  %vm770_vm14 = vmor %vm768_vm13, %vm769_vm11  ;;  %v759_v62 = vand.u32 2147483648, %v714_v37  ;;  %v1024_v33 = vld [vmem:[%s1969_s6 + $0x8] sm:$0xff] }
 0x3aa   : > { %v765_v40 = vsub.f32 1.0, %v764_v36  ;;  %v1355_v41 = vunpack.i.l.bf16 %v1354_v39  ;;  %v1356_v42 = vunpack.i.h.bf16 %v1354_v39  ;;  %vm740_vm2 = vmor %vm738_vm15, %vm739_vm12  ;;  %v757_v2 = vand.u32 2147483647, %v714_v37  ;;  %v1062_v36 = vld [vmem:[%s1971_s8 + $0x38] sm:$0xff] }
 0x3ab   : > { %v735_v44 = vsub.f32 1.0, %v734_v38  ;;  %vm753_vm6 = vweird.f32 %v714_v37  ;;  %v760_v4 = vor.u32 1.1754944e-38, %v759_v62  ;;  %vm1067_vm11 = vcmask 523264  }
 0x3ac   : > { %v766_v45 = vmul.f32 %v1383_v34, %v765_v40  ;;  %807 = vmatpush.msrb.mxu2 %v1355_v41  ;;  %833 = vmatpush.msra.mxu3 %v1356_v42  ;;  %vm758_vm8 = vcmp.eq.f32.partialorder %v757_v2, 8.507059e+37  ;;  %v1060_v41 = vld [vmem:[%s1971_s8 + $0x28] sm:$0xff] }
 0x3ad   : > { %v736_v48 = vmul.f32 %v1385_v35, %v735_v44  ;;  %1264 = vmatmul.msk.f32.vlgmr.msrb.gmra.mxu2 %vm571_vm5, %v778_v31 }
 0x3ae   : > { %v767_v50 = vadd.f32 %v1383_v34, %v766_v45  ;;  %933 = vmatpush.msrb.mxu3 %v890_v11  ;;  %v1058_v45 = vld [vmem:[%s1971_s8 + $0x18] sm:$0xff] }
 0x3af   : > { %v1387_v51 = vpop.eup %1386  ;;  %v737_v53 = vadd.f32 %v1385_v35, %v736_v48 }
 0x3b0   : > { %v771_v54 = vsel %vm770_vm14, %v1383_v34, %v767_v50  ;;  %v749_v56 = vmul.f32 %v1387_v51, %v714_v37  ;;  %vm754_vm4 = vweird.f32 %v1387_v51  ;;  %v1061_v37 = vld [vmem:[%s1971_s8 + $0x30] sm:$0xff] }
 0x3b1   : > { %v776_v57 = vsel %vm773_vm1, %v775_v52, %v771_v54  ;;  %v741_v58 = vsel %vm740_vm2, %v1385_v35, %v737_v53  ;;  %vm755_vm7 = vmor %vm753_vm6, %vm754_vm4  ;;  %v1023_v35 = vld [vmem:[%s1969_s6] sm:$0xff] }
 0x3b2   : > { %v750_v59 = vsub.f32 1.0, %v749_v56  ;;  %v746_v60 = vsel %vm743_vm3, %v745_v55, %v741_v58  ;;  %v781_v61 = vmul.f32 %v1800_v10, %v776_v57  ;;  %v1364_v52 = vld [vmem:[%s1973_s10] ss:$0 sm:$0xff]  ;;  %v1057_v58 = vld [vmem:[%s1971_s8 + $0x10] sm:$0xff] }
 0x3b3   : > { %v779_v63 = vmul.f32 %v1802_v12, %v746_v60  ;;  %v891_v12 = vld [vmem:[%s1966_s3 + $0x8] sm:$0xff]  ;;  %v1365_v55 = vld [vmem:[%s1974_s11] ss:$0 sm:$0xff] }
 0x3b4   : > { %v751_v1 = vmul.f32 %v1387_v51, %v750_v59  ;;  %785 = vst.msk [vmem:[%s1817_s24 + $0x18] sm:$0xff] %vm571_vm5, %v781_v61  ;;  %910 = vmatpush.msra.mxu2 %v891_v12  ;;  %v1056_v59 = vld [vmem:[%s1971_s8 + $0x8] sm:$0xff]  ;;  %v1055_v60 = vld [vmem:[%s1971_s8] sm:$0xff] }
 0x3b5   : > { %783 = vst.msk [vmem:[%s1817_s24 + $0x8] sm:$0xff] %vm571_vm5, %v779_v63  ;;  %1265 = vmatmul.msk.f32.vlgmr.msra.gmra.mxu3 %vm571_vm5, %v779_v63 }
 0x3b6   : > { %v752_v3 = vadd.f32 %v1387_v51, %v751_v1  ;;  %1046 = vmatpush.msrb.mxu2 %v1026_v32  ;;  %1079 = vmatpush.msra.mxu3 %v1062_v36 }
 0x3b8   : > { %v756_v5 = vsel %vm755_vm7, %v1387_v51, %v752_v3  ;;  %1080 = vmatpush.msra.mxu3 %v1061_v37 }
 0x3b9   : > { %v761_v6 = vsel %vm758_vm8, %v760_v4, %v756_v5 }
 0x3ba   : > { %v780_v7 = vmul.f32 %v1808_v16, %v761_v6  ;;  %1081 = vmatpush.msra.mxu3 %v1060_v41 }
 0x3bc   : > { %784 = vst.msk [vmem:[%s1817_s24 + $0x10] sm:$0xff] %vm571_vm5, %v780_v7  ;;  %1082 = vmatpush.msra.mxu3 %v1059_v43 }
 0x3be   : > { %1083 = vmatpush.msra.mxu3 %v1058_v45 }
 0x3c0   : > { %v1359_v8 = vpop.permute.xlu1 %1358  ;;  %1084 = vmatpush.msra.mxu3 %v1057_v58 }
 0x3c1   : > { %v1361_v9 = vunpack.i.h.bf16 %v1359_v8  ;;  %v1360_v10 = vunpack.i.l.bf16 %v1359_v8 }
 0x3c2   : > { %1085 = vmatpush.msra.mxu3 %v1056_v59 }
 0x3c3   : > { %859 = vmatpush.msra.mxu0 %v1360_v10  ;;  %885 = vmatpush.msra.mxu1 %v1361_v9 }
 0x3c4   : > { %1266 = vmatmul.msk.f32.vlgmr.msra.gmra.mxu0 %vm571_vm5, %v780_v7  ;;  %1267 = vmatmul.msk.f32.vlgmr.msra.gmra.mxu1 %vm571_vm5, %v781_v61  ;;  %v1366_v61 = vld [vmem:[%s1970_s7] ss:$0 sm:$0xff] }
 0x3c5   : > { %957 = vmatpush.msrb.mxu0 %v938_v13  ;;  %982 = vmatpush.msrb.mxu1 %v963_v15 }
 0x3c6   : > { %1086 = vmatpush.msra.mxu3 %v1055_v60 }
 0x430   : > { %v809_v16 = vpop.f32.mrf.mxu2 }
 0x431   : > { %1269 = vmatmul.msk.f32.vlgmr.msrb.gmra.mxu3 %vm571_vm5, %v809_v16 }
 0x438   : > { %v835_v17 = vpop.f32.mrf.mxu3 }
 0x439   : > { %1268 = vmatmul.msk.f32.vlgmr.msra.gmra.mxu2 %vm571_vm5, %v835_v17 }
 0x441   : > { %v861_v18 = vpop.f32.mrf.mxu0  ;;  %v887_v19 = vpop.f32.mrf.mxu1 }
 0x442   : > { %1270 = vmatmul.msk.f32.vlgmr.msrb.gmra.mxu0 %vm571_vm5, %v861_v18  ;;  %1271 = vmatmul.msk.f32.vlgmr.msrb.gmra.mxu1 %vm571_vm5, %v887_v19 }
 0x4b4   : > { %v935_v20 = vpop.f32.mrf.mxu3 }
 0x4bc   : > { %v912_v21 = vpop.f32.mrf.mxu2 }
 0x4bd   : > { %v936_v22 = vadd.f32 %v935_v20, %v912_v21 }
 0x4bf   : > { %v959_v23 = vpop.f32.mrf.mxu0  ;;  %v984_v25 = vpop.f32.mrf.mxu1 }
 0x4c0   : > { %v962_v24 = vadd.f32 %v959_v23, %v936_v22 }
 0x4c2   : > { %v987_v26 = vadd.f32 %v984_v25, %v962_v24 }
 0x4c4   : > { %v1851_v27 = vadd.f32 %v987_v26, %v1740_v0  ;;  %v1025_v0 = vld [vmem:[%s1969_s6 + $0x10] sm:$0xff] }
 0x4c5   : > { %1047 = vmatpush.msrb.mxu2 %v1025_v0 }
 0x4c6   : > { %v989_v28 = vsel %vm485_vm0, %v1851_v27, 0.0  ;;  %v993_v29 = vmul.f32 %v1851_v27, %v1851_v27 }
 0x4c7   : > { %990 = vadd.xlane.f32.xlu0 %v989_v28  ;;  %1048 = vmatpush.msrb.mxu2 %v1024_v33 }
 0x4c8   : > { %v994_v30 = vsel %vm485_vm0, %v993_v29, 0.0 }
 0x4c9   : > { %1049 = vmatpush.msrb.mxu2 %v1023_v35 }
 0x4cf   : > { %995 = vadd.xlane.f32.xlu0 %v994_v30 }
 0x53a   : > { %v991_v31 = vpop.xlane.xlu0 %990 }
 0x53b   : > { %v992_v34 = vmul.f32 %v991_v31, %v1756_v14 }
 0x53d   : > { %v998_v39 = vmul.f32 %v992_v34, %v992_v34  ;;  %v1000_v51 = vsub.f32 %v1851_v27, %v992_v34 }
 0x542   : > { %v996_v38 = vpop.xlane.xlu0 %995 }
 0x543   : > { %v997_v40 = vmul.f32 %v996_v38, %v1756_v14 }
 0x545   : > { %v999_v42 = vsub.f32 %v997_v40, %v998_v39 }
 0x547   : > { %v1001_v44 = vadd.f32 1e-06, %v999_v42 }
 0x549   : > { %1388 = vrsqrt.f32 %v1001_v44  ;;  %vm1008_vm9 = vweird.f32 %v1001_v44 }
 0x54f   : > { %v1389_v14 = vpop.eup %1388 }
 0x550   : > { %v1003_v46 = vmul.f32 %v1389_v14, %v1001_v44  ;;  %vm1009_vm5 = vweird.f32 %v1389_v14 }
 0x551   : > { %vm1010_vm10 = vmor %vm1008_vm9, %vm1009_vm5 }
 0x552   : > { %v1004_v47 = vmul.f32 %v1389_v14, %v1003_v46 }
 0x554   : > { %v1005_v48 = vmul.f32 0.5, %v1004_v47 }
 0x556   : > { %v1006_v49 = vsub.f32 1.5, %v1005_v48 }
 0x558   : > { %v1007_v50 = vmul.f32 %v1389_v14, %v1006_v49 }
 0x55a   : > { %v1011_v53 = vsel %vm1010_vm10, %v1389_v14, %v1007_v50 }
 0x55b   : > { %v1012_v54 = vmul.f32 %v1011_v53, %v1000_v51 }
 0x55d   : > { %v1017_v56 = vmul.f32 %v1364_v52, %v1012_v54 }
 0x55f   : > { %v1022_v57 = vadd.f32 %v1365_v55, %v1017_v56 }
 0x561   : > { %1272 = vmatmul.msk.f32.vlgmr.msrb.gmra.mxu2 %vm485_vm0, %v1022_v57 }
 0x5e4   : > { %v1051_v62 = vpop.f32.mrf.mxu2 }
 0x5e5   : > { %v1052_v63 = vadd.f32 %v1366_v61, %v1051_v62 }
 0x5e7   : > { %v1054_v1 = vmax.f32 %v1052_v63, 0.0 }
 0x5e9   : > { %1273 = vmatmul.msk.f32.vlgmr.msra.gmra.mxu3 %vm1067_vm11, %v1054_v1 }
 0x5ea   : > { %1477 = shalt.err (!%p1474_p11)
}
 0x5eb   : > { %s1561_s24 = smov 128   ;;  %s1562_s1 = smov 8   ;;  %v1367_v2 = vld [vmem:[%s1972_s9] ss:$0 sm:$0xff] }
 0x5ec   : > { %1289 = dma.vmem_to_hbm [thread:$0]  (%p1699_p3), %s1126_s12, 512, %s1128_s27, %s1099_s14, %s1561_s24, %s1561_s24, %s1562_s1  }
 0x5ed   : > { %s1276_s22 = sshll.u32 %s1654_s29, 3  ;;  %s2001_s21 = sld [smem:[#allocation22_spill]] }
 0x5ee   : > { %s2002_s30 = sshll.u32 %s1726_s17, 3  ;;  %s1094_s29 = scalar_lea.sflag [#allocation4], %s1726_s17 }
 0x5ef   : > { %s476_s23 = scalar_lea.vmem [#allocation7], %s2002_s30 }
 0x5f0   : > { %s1111_s15 = sshll.u32 %s476_s23, 4  ;;  %s1112_s15 = int_to_ptr.vmem [resolvable:$true] %s1111_s15 }
 0x5f3   : > { %s1109_s19 = scalar_lea.hbm %s2001_s21, %s1276_s22  ;;  %s1498_s1 = scalar_lea.hbm %s2001_s21, 16 }
 0x5f4   : > { %s1113_s2 = sshll.u32 %s1109_s19, 4  ;;  %s1114_s2 = int_to_ptr.hbm [resolvable:$true] %s1113_s2 }
 0x5f5   : > { %s1492_s12 = sshra.s32 %s1114_s2, 4  ;;  %s1493_s12 = int_to_ptr.hbm [resolvable:$true] %s1492_s12 }
 0x5f6   : > { %s1494_s27 = scalar_lea.hbm %s1493_s12, 8  ;;  %p1499_p5 = scmp.lt.s32.totalorder %s1493_s12, %s2001_s21 }
 0x5f7   : > { %p1495_p12 = scmp.ne.s32.totalorder %s1493_s12, %s1494_s27  ;;  %p1500_p7 = scmp.lt.s32.totalorder %s1498_s1, %s1494_s27 }
 0x5f9   : > { %p1496_p13 = pnand %p1495_p12, %p1699_p3  ;;  %p1501_p1 = por %p1500_p7, %p1499_p5 }
 0x5fb   : > { %p1497_p0 = pneg %p1496_p13 }
 0x5fd   : > { %p1502_p4 = pnand %p1501_p1, %p1497_p0 }
 0x66c   : > { %v1088_v3 = vpop.f32.mrf.mxu3 }
 0x66d   : > { %v1089_v4 = vadd.f32 %v1367_v2, %v1088_v3 }
 0x66f   : > { %v1091_v5 = vadd.f32 %v1089_v4, %v1851_v27 }
 0x671   : > { %1092 = vst.msk [vmem:[%s476_s23] sm:$0xff] %vm485_vm0, %v1091_v5 }
 0x672   : > { %1505 = shalt.err (!%p1502_p4)
}
 0x673   : > { %1288 = dma.vmem_to_hbm [thread:$0]  (%p1699_p3), %s1112_s15, 128, %s1114_s2, %s1094_s29  }
 0x674 PF: > { %s2003_s17 = sld [smem:[#allocation14_spill]]  ;;  %p2005_p8 = scmp.ge.s32.totalorder %s1552_s28, 2 }
 0x676   : > { %p1301_p9 = pnand %p2005_p8, %p1668_p6 }
 0x678   : > { %p1302_p10 = pneg %p1301_p9 }
 0x67a   : > { %s1142_s18 = sand.u32 1, %s2003_s17  }
 0x67b   : > { %s1143_s0 = scalar_lea.sflag [#allocation4], %s1142_s18 }
 0x67c   : > { %1531 = dma.done.wait (%p1302_p10), %s1143_s0, 128  }
 0x67d   : > { %1533 = vsyncadd (%p1302_p10), %s1143_s0, 4294967168  ;;  %s1153_s19 = scalar_lea.sflag [#allocation9], %s1142_s18 }
 0x67e   : > { %1535 = dma.done.wait (%p1302_p10), %s1153_s19, 512  }
 0x67f   : > { %1537 = vsyncadd (%p1302_p10), %s1153_s19, 4294966784  ;;  %s2006_s28 = sld [smem:[#allocation17_spill]]  ;;  %s2009_s25 = smov %s1544_s26 }
 0x680   : > { %s2007_s30 = sld [smem:[#allocation15_spill]] }
 0x681   : > { %s2008_s27 = sld [smem:[#allocation18_spill]] }
 0x685   : > { %p31_p3 = scmp.ge.s32.totalorder %s2006_s28, 4  }
 0x686   : > { %s2010_s26 = smov %s2007_s30 }
 0x687   :  { %33 = sbr.rel (!%p31_p3) target bundleno = 13 (0xd), region = 134 }
 0x68c   :  { %1159 = vsyncpa [#allocation3], 1 }
 0x68d   :  { %1161 = vsyncpa [#allocation3 + $0x1], 1 }
 0x68e   :  { %1162 = vsyncpa [#allocation6], 1 }
 0x68f   :  { %1163 = vsyncpa [#allocation4], 1 }
 0x690   :  { %1165 = vsyncpa [#allocation4 + $0x1], 1 }
 0x691   :  { %1166 = vsyncpa [#allocation9], 1 }
 0x692   :  { %1168 = vsyncpa [#allocation9 + $0x1], 1 }

</bundles_post_ra>
